<compile_context>
chip_gen: v7x
topology: tpu7x:2x2x1
jax: 0.10.0
libtpu: 0.0.40
codegen_flags: <defaults>
</compile_context>

<pallas_src>
import functools
import math

import jax
import jax.numpy as jnp
from jax.experimental import pallas as pl
from jax.experimental.pallas import tpu as pltpu


# ---------------------------------------------------------------------------
# Kernels
# ---------------------------------------------------------------------------
def _mm_accum(x_ref, w_ref, y_ref):
    """y[i, j] += x_tile[i, k] · w_tile[j, k] (contraction on dim 1 of both
    operands — no materialized transpose).  Accumulates directly into the
    f32 output block, which is VMEM-resident across the (last) k axis."""
    @pl.when(pl.program_id(2) == 0)
    def _():
        y_ref[...] = jnp.zeros_like(y_ref)

    y_ref[...] += jax.lax.dot_general(
        x_ref[...],
        w_ref[...],
        dimension_numbers=(((1,), (1,)), ((), ())),
        preferred_element_type=jnp.float32,
    )


def _matmul_kernel(x_ref, w_ref, y_ref):
    """Plain tiled matmul (used when a general Normal prior is supplied)."""
    _mm_accum(x_ref, w_ref, y_ref)


def _matmul_std_logp_kernel(x_ref, w_ref, y_ref, logp_ref):
    """Matmul fused with the standard-normal (N(0,1)) prior log-prob partial.

    logp_ref is an (8, 128) block unique to this (i, j) grid position; every
    element of the block holds the same accumulated scalar -0.5*sum(w_tile^2)
    (scalar broadcast-add — cheap, and keeps the block shape (8,128)-legal).
    Only the i == 0 row of the grid contributes; i > 0 blocks are written as
    zeros.  Constant terms are added once in the wrapper."""
    @pl.when(pl.program_id(2) == 0)
    def _():
        logp_ref[...] = jnp.zeros_like(logp_ref)

    _mm_accum(x_ref, w_ref, y_ref)

    @pl.when(pl.program_id(0) == 0)
    def _():
        w = w_ref[...].astype(jnp.float32)
        logp_ref[...] += -0.5 * jnp.sum(w * w)


def _logp_general_kernel(w_ref, loc_ref, inv_scale_ref, logp_ref):
    """General Normal prior: per-j partial of -0.5 * sum(((w - loc)*inv_scale)^2).

    Runs once per (D_out, D_in) weight tile (independent of batch).  1/scale is
    precomputed in the wrapper; log(scale) and log(2*pi) constants are fixed
    prior parameters added once in the wrapper.  Each j owns its own (8,128)
    partial block, so the j axis is safely 'parallel'."""
    @pl.when(pl.program_id(1) == 0)
    def _():
        logp_ref[...] = jnp.zeros_like(logp_ref)

    z = (w_ref[...].astype(jnp.float32) - loc_ref[...]) * inv_scale_ref[...]
    logp_ref[...] += -0.5 * jnp.sum(z * z)


# ---------------------------------------------------------------------------
# Wrapper
# ---------------------------------------------------------------------------
def _round_up(x, m):
    return ((x + m - 1) // m) * m


def _pad2d(a, target_shape):
    pads = tuple((0, t - s) for s, t in zip(a.shape, target_shape))
    if any(p[1] for p in pads):
        a = jnp.pad(a, pads)
    return a


@functools.partial(jax.jit, static_argnames=("tm", "tn", "tk", "matmul_dtype"))
def bnn_layer_forward(
    x,
    w,
    prior_loc=None,
    prior_scale=None,
    *,
    tm=128,
    tn=512,
    tk=None,
    matmul_dtype=jnp.bfloat16,
):
    """BNN layer forward.

    x:            [B, D_in]       activations
    w:            [D_out, D_in]   sampled weights (reparameterized sample)
    prior_loc:    [D_out, D_in] or None (None => standard N(0,1) prior, the
                  PyTorch __init__ default)
    prior_scale:  [D_out, D_in] or None
    returns (y [B, D_out] f32, logp_w scalar f32)
    """
    B, d_in = x.shape
    d_out, d_in_w = w.shape
    assert d_in == d_in_w

    mm_dt = jnp.dtype(matmul_dtype)
    if tk is None:
        tk = 2048 if mm_dt == jnp.dtype(jnp.bfloat16) else 1024

    # Clamp tiles to the sublane/lane rounded-up problem dims; keep tn/tk
    # multiples of 128 and tm a multiple of 8 so every BlockSpec is legal.
    tm = min(tm, _round_up(B, 8))
    n_al = _round_up(d_out, 128)
    k_al = _round_up(d_in, 128)
    tn = min(tn, n_al)
    tk = min(tk, k_al)
    # Megacore (v7x has 2 TCs): if the whole batch fits one row tile, make
    # sure the output-column (parallel) axis has at least two blocks.
    if B <= tm and n_al >= 256 and n_al // tn < 2:
        tn = _round_up(-(-n_al // 2), 128)

    bp = _round_up(B, tm)
    np_ = _round_up(d_out, tn)
    kp = _round_up(d_in, tk)

    # Single padded copy of each operand, directly in the MXU dtype.  Zero
    # padding is exact for the matmul and for both log-prob sums.
    x_mm = _pad2d(x.astype(mm_dt), (bp, kp))
    w_mm = _pad2d(w.astype(mm_dt), (np_, kp))

    grid = (bp // tm, np_ // tn, kp // tk)

    # Explicit VMEM budget with headroom (double-buffered in/out tiles);
    # safe under v7x's 64 MiB physical VMEM.
    footprint = (
        2 * (tm * tk + tn * tk) * mm_dt.itemsize  # x/w input tiles
        + 2 * (tm * tn * 4)                       # f32 output tile
        + 2 * (8 * 128 * 4)                       # logp partial block
    )
    vmem_limit = int(min(60 * 2**20, max(24 * 2**20, 3 * footprint)))

    mm_params = pltpu.CompilerParams(
        dimension_semantics=("parallel", "parallel", "arbitrary"),
        vmem_limit_bytes=vmem_limit,
    )

    n_elem = d_out * d_in
    const = -0.5 * n_elem * math.log(2.0 * math.pi)

    x_spec = pl.BlockSpec((tm, tk), lambda i, j, k: (i, k))
    w_spec = pl.BlockSpec((tn, tk), lambda i, j, k: (j, k))
    y_spec = pl.BlockSpec((tm, tn), lambda i, j, k: (i, j))

    if prior_loc is None:
        # Exact PyTorch default prior N(0,1): log-prob fused into the matmul —
        # w is streamed from HBM exactly once.
        y, logp_part = pl.pallas_call(
            _matmul_std_logp_kernel,
            out_shape=(
                jax.ShapeDtypeStruct((bp, np_), jnp.float32),
                jax.ShapeDtypeStruct((grid[0] * 8, grid[1] * 128), jnp.float32),
            ),
            grid_spec=pltpu.PrefetchScalarGridSpec(
                num_scalar_prefetch=0,
                grid=grid,
                in_specs=[x_spec, w_spec],
                out_specs=[
                    y_spec,
                    pl.BlockSpec((8, 128), lambda i, j, k: (i, j)),
                ],
            ),
            compiler_params=mm_params,
        )(x_mm, w_mm)
        # Row 0 of blocks (i == 0) carries the partials; one lane per j block.
        logp = jnp.sum(logp_part[0, ::128]) + const
    else:
        assert prior_scale is not None
        y = pl.pallas_call(
            _matmul_kernel,
            out_shape=jax.ShapeDtypeStruct((bp, np_), jnp.float32),
            grid_spec=pltpu.PrefetchScalarGridSpec(
                num_scalar_prefetch=0,
                grid=grid,
                in_specs=[x_spec, w_spec],
                out_specs=y_spec,
            ),
            compiler_params=mm_params,
        )(x_mm, w_mm)

        # Fixed prior parameters: precompute 1/scale and sum(log scale) once.
        loc32 = _pad2d(prior_loc.astype(jnp.float32), (np_, kp))
        inv_scale32 = _pad2d((1.0 / prior_scale).astype(jnp.float32), (np_, kp))
        wgrid = (np_ // tn, kp // tk)
        wtile = pl.BlockSpec((tn, tk), lambda j, k: (j, k))
        logp_part = pl.pallas_call(
            _logp_general_kernel,
            out_shape=jax.ShapeDtypeStruct((wgrid[0] * 8, 128), jnp.float32),
            grid_spec=pltpu.PrefetchScalarGridSpec(
                num_scalar_prefetch=0,
                grid=wgrid,
                in_specs=[wtile, wtile, wtile],
                out_specs=pl.BlockSpec((8, 128), lambda j, k: (j, 0)),
            ),
            compiler_params=pltpu.CompilerParams(
                dimension_semantics=("parallel", "arbitrary"),
                vmem_limit_bytes=vmem_limit,
            ),
        )(w_mm, loc32, inv_scale32)
        logp = (
            jnp.sum(logp_part[::8, 0])
            + const
            - jnp.sum(jnp.log(prior_scale.astype(jnp.float32)))
        )

    return y[:B, :d_out], logp


# ---------------------------------------------------------------------------
# Pure-JAX reference
# ---------------------------------------------------------------------------
def reference_forward(x, w, prior_loc=None, prior_scale=None):
    y = jax.lax.dot_general(
        x.astype(jnp.float32),
        w.astype(jnp.float32),
        dimension_numbers=(((1,), (1,)), ((), ())),
        precision=jax.lax.Precision.HIGHEST,
    )
    if prior_loc is None:
        loc = jnp.zeros_like(w, dtype=jnp.float32)
        scale = jnp.ones_like(w, dtype=jnp.float32)
    else:
        loc, scale = prior_loc, prior_scale
    z = (w.astype(jnp.float32) - loc) / scale
    logp = jnp.sum(
        -0.5 * z * z - jnp.log(scale) - 0.5 * math.log(2.0 * math.pi)
    )
    return y, logp


if __name__ == "__main__":
    key = jax.random.PRNGKey(0)
    k1, k2, k3, k4, k5, k6 = jax.random.split(key, 6)

    # --- Case 1: default N(0,1) prior (exact PyTorch __init__), bf16 MXU
    # operands (default), small tiles so the multi-tile fused path
    # (grid (2,2,2), i>0 gating, per-(i,j) logp partials) is exercised.
    B1, din1, dout1 = 32, 256, 256
    x1 = jax.random.normal(k1, (B1, din1), dtype=jnp.float32)
    eps1 = jax.random.normal(k2, (dout1, din1), dtype=jnp.float32)
    w1 = eps1  # loc = 0, scale = 1  =>  w = eps
    y1, logp1 = bnn_layer_forward(x1, w1, tm=16, tn=128, tk=128)
    jax.block_until_ready((y1, logp1))

    # Reference on the same bf16-quantized operands (kernel feeds bf16 tiles
    # into f32 accumulation) -> tight check of the kernel itself.
    x1q = x1.astype(jnp.bfloat16).astype(jnp.float32)
    w1q = w1.astype(jnp.bfloat16).astype(jnp.float32)
    y1_ref, logp1_ref = reference_forward(x1q, w1q)
    assert y1.shape == (B1, dout1)
    assert jnp.allclose(y1, y1_ref, atol=1e-2, rtol=1e-3)
    assert jnp.allclose(logp1, logp1_ref, rtol=1e-4, atol=1e-2)
    # Sanity vs the full-precision weights (bf16 quantization of w only
    # perturbs the log-prob by ~1e-5 relative at this size).
    _, logp1_true = reference_forward(x1, w1)
    assert jnp.allclose(logp1, logp1_true, rtol=1e-3)

    # --- Case 2: general Normal prior with unaligned shapes (exercises the
    # padding path, the plain-matmul kernel and the loc/scale kernel), f32
    # matmul operands to also cover that path.
    B2, din2, dout2 = 20, 200, 72
    x2 = jax.random.normal(k3, (B2, din2), dtype=jnp.float32)
    loc2 = 0.3 * jax.random.normal(k4, (dout2, din2), dtype=jnp.float32)
    scale2 = 0.5 + jax.random.uniform(k5, (dout2, din2), dtype=jnp.float32)
    eps2 = jax.random.normal(k6, (dout2, din2), dtype=jnp.float32)
    w2 = loc2 + scale2 * eps2
    y2, logp2 = bnn_layer_forward(x2, w2, loc2, scale2, matmul_dtype=jnp.float32)
    jax.block_until_ready((y2, logp2))

    y2_ref, logp2_ref = reference_forward(x2, w2, loc2, scale2)
    assert y2.shape == (B2, dout2)
    assert jnp.allclose(y2, y2_ref, atol=1e-3, rtol=1e-3)
    assert jnp.allclose(logp2, logp2_ref, rtol=1e-4, atol=1e-2)

    print("KERNEL_OK")
</pallas_src>

<mosaic_0001>
module attributes {stable_mosaic.version = 11 : i64} {
  func.func @_matmul_std_logp_kernel(%arg0: i32, %arg1: i32, %arg2: i32, %arg3: memref<16x128xbf16, #tpu.memory_space<vmem>>, %arg4: memref<128x128xbf16, #tpu.memory_space<vmem>>, %arg5: memref<16x128xf32, #tpu.memory_space<vmem>>, %arg6: memref<8x128xf32, #tpu.memory_space<vmem>>) attributes {dimension_semantics = [#tpu.dimension_semantics<parallel>, #tpu.dimension_semantics<parallel>, #tpu.dimension_semantics<arbitrary>], iteration_bounds = array<i64: 2, 2, 2>, scalar_prefetch = 0 : i64, scratch_operands = 0 : i64, tpu.core_type = #tpu.core_type<tc>, window_params = [{transform_indices = @transform_0, window_bounds = array<i64: 16, 128>}, {transform_indices = @transform_1, window_bounds = array<i64: 128, 128>}, {transform_indices = @transform_2, window_bounds = array<i64: 16, 128>}, {transform_indices = @transform_3, window_bounds = array<i64: 8, 128>}]} {
    %c0_i32 = arith.constant 0 : i32
    %0 = arith.cmpi eq, %arg2, %c0_i32 : i32
    %1 = arith.extui %0 : i1 to i32
    %c0_i32_0 = arith.constant 0 : i32
    %2 = arith.cmpi ne, %1, %c0_i32_0 : i32
    scf.if %2 {
      %cst_12 = arith.constant 0.000000e+00 : f32
      %15 = vector.broadcast %cst_12 : f32 to vector<8x128xf32>
      %c0_13 = arith.constant 0 : index
      %c0_14 = arith.constant 0 : index
      %16 = vector.load %arg6[%c0_13, %c0_14] : memref<8x128xf32, #tpu.memory_space<vmem>>, vector<8x128xf32>
      tpu.vector_store %arg6[%c0_13, %c0_14], %15 {strides = array<i32>} : memref<8x128xf32, #tpu.memory_space<vmem>>, vector<8x128xf32>,
    } else {
    }
    %c0_i32_1 = arith.constant 0 : i32
    %3 = arith.cmpi eq, %arg2, %c0_i32_1 : i32
    %4 = arith.extui %3 : i1 to i32
    %c0_i32_2 = arith.constant 0 : i32
    %5 = arith.cmpi ne, %4, %c0_i32_2 : i32
    scf.if %5 {
      %cst_12 = arith.constant 0.000000e+00 : f32
      %15 = vector.broadcast %cst_12 : f32 to vector<16x128xf32>
      %c0_13 = arith.constant 0 : index
      %c0_14 = arith.constant 0 : index
      %16 = vector.load %arg5[%c0_13, %c0_14] : memref<16x128xf32, #tpu.memory_space<vmem>>, vector<16x128xf32>
      tpu.vector_store %arg5[%c0_13, %c0_14], %15 {strides = array<i32>} : memref<16x128xf32, #tpu.memory_space<vmem>>, vector<16x128xf32>,
    } else {
    }
    %c0 = arith.constant 0 : index
    %c0_3 = arith.constant 0 : index
    %6 = vector.load %arg5[%c0, %c0_3] : memref<16x128xf32, #tpu.memory_space<vmem>>, vector<16x128xf32>
    %c0_4 = arith.constant 0 : index
    %c0_5 = arith.constant 0 : index
    %7 = vector.load %arg3[%c0_4, %c0_5] : memref<16x128xbf16, #tpu.memory_space<vmem>>, vector<16x128xbf16>
    %c0_6 = arith.constant 0 : index
    %c0_7 = arith.constant 0 : index
    %8 = vector.load %arg4[%c0_6, %c0_7] : memref<128x128xbf16, #tpu.memory_space<vmem>>, vector<128x128xbf16>
    %cst = arith.constant dense<0.000000e+00> : vector<16x128xf32>
    %9 = tpu.matmul %7, %8, %cst {dimension_numbers = #tpu.dot_dimension_numbers<[1], [1], [0], [0], [0, 0, 1, 0], [], []>} : vector<16x128xbf16>, vector<128x128xbf16>, vector<16x128xf32> -> vector<16x128xf32>
    %10 = arith.addf %6, %9 : vector<16x128xf32>
    %c0_8 = arith.constant 0 : index
    %c0_9 = arith.constant 0 : index
    %11 = vector.load %arg5[%c0_8, %c0_9] : memref<16x128xf32, #tpu.memory_space<vmem>>, vector<16x128xf32>
    tpu.vector_store %arg5[%c0_8, %c0_9], %10 {strides = array<i32>} : memref<16x128xf32, #tpu.memory_space<vmem>>, vector<16x128xf32>,
    %c0_i32_10 = arith.constant 0 : i32
    %12 = arith.cmpi eq, %arg0, %c0_i32_10 : i32
    %13 = arith.extui %12 : i1 to i32
    %c0_i32_11 = arith.constant 0 : i32
    %14 = arith.cmpi ne, %13, %c0_i32_11 : i32
    scf.if %14 {
      %c0_12 = arith.constant 0 : index
      %c0_13 = arith.constant 0 : index
      %15 = vector.load %arg4[%c0_12, %c0_13] : memref<128x128xbf16, #tpu.memory_space<vmem>>, vector<128x128xbf16>
      %16 = arith.extf %15 : vector<128x128xbf16> to vector<128x128xf32>
      %c0_14 = arith.constant 0 : index
      %c0_15 = arith.constant 0 : index
      %17 = vector.load %arg6[%c0_14, %c0_15] : memref<8x128xf32, #tpu.memory_space<vmem>>, vector<8x128xf32>
      %18 = arith.mulf %16, %16 : vector<128x128xf32>
      %19 = vector.shape_cast %18 : vector<128x128xf32> to vector<1x128x128xf32>
      %cst_16 = arith.constant dense<0.000000e+00> : vector<1xf32>
      %20 = vector.multi_reduction <add>, %19, %cst_16 [1, 2] : vector<1x128x128xf32> to vector<1xf32>
      %21 = vector.shape_cast %20 : vector<1xf32> to vector<1x1x1xf32>
      %22 = vector.extract %21[0, 0, 0] : f32 from vector<1x1x1xf32>
      %cst_17 = arith.constant -5.000000e-01 : f32
      %23 = arith.mulf %cst_17, %22 : f32
      %24 = vector.broadcast %23 : f32 to vector<8x128xf32>
      %25 = arith.addf %17, %24 : vector<8x128xf32>
      %c0_18 = arith.constant 0 : index
      %c0_19 = arith.constant 0 : index
      %26 = vector.load %arg6[%c0_18, %c0_19] : memref<8x128xf32, #tpu.memory_space<vmem>>, vector<8x128xf32>
      tpu.vector_store %arg6[%c0_18, %c0_19], %25 {strides = array<i32>} : memref<8x128xf32, #tpu.memory_space<vmem>>, vector<8x128xf32>,
    } else {
    }
    return
  }
  func.func @transform_0(%arg0: i32, %arg1: i32, %arg2: i32) -> (i32, i32) {
    %c0_i32 = arith.constant 0 : i32
    return %arg0, %arg2 : i32, i32
  }
  func.func @transform_1(%arg0: i32, %arg1: i32, %arg2: i32) -> (i32, i32) {
    %c0_i32 = arith.constant 0 : i32
    return %arg1, %arg2 : i32, i32
  }
  func.func @transform_2(%arg0: i32, %arg1: i32, %arg2: i32) -> (i32, i32) {
    %c0_i32 = arith.constant 0 : i32
    return %arg0, %arg1 : i32, i32
  }
  func.func @transform_3(%arg0: i32, %arg1: i32, %arg2: i32) -> (i32, i32) {
    %c0_i32 = arith.constant 0 : i32
    return %arg0, %arg1 : i32, i32
  }
}

</mosaic_0001>

<bundles_post_ra>
// kernel: bnn_layer_forward.1
= control target key start
LH: loop header
LB: loop body
LE: loop exit
PB: predicated region body
PF: predicated region fallthrough
CT: control target
= control target key end

     0   :  { %s1488_s0 = inlined_call_operand.vmem [shape: bf16[32,256], index: 0, kind: input, shape index: {}]   ;;  %s1489_s1 = inlined_call_operand.vmem [shape: bf16[256,256], index: 1, kind: input, shape index: {}]   ;;  %s1490_s2 = inlined_call_operand.hbm [shape: f32[32,256], index: 2, kind: output, shape index: {0}]   ;;  %s1491_s3 = inlined_call_operand.vmem [shape: f32[16,256], index: 3, kind: output, shape index: {1}]  }
   0x1   :  { %1498 = sst [smem:[#allocation13_spill]] %s1488_s0 }
   0x2   :  { %1499 = sst [smem:[#allocation14_spill]] %s1489_s1 }
   0x3   :  { %1500 = sst [smem:[#allocation15_spill]] %s1490_s2 }
   0x4   :  { %1501 = sst [smem:[#allocation16_spill]] %s1491_s3 }
   0x5   :  { %9 = vsyncpa [#allocation5], 0 }
   0x6   :  { %11 = vsyncpa [#allocation5 + $0x1], 0  ;;  %s1183_s12 = smov 0   ;;  %s1185_s13 = smov 0  }
   0x7   :  { %s1187_s14 = smov 0   ;;  %s1189_s15 = smov 0  }
   0x8   :  { %s1191_s16 = smov 0   ;;  %s1193_s17 = smov 0  }
   0x9   :  { %s1195_s18 = smov 0   ;;  %s1197_s19 = smov 0  }
   0xa   :  { %s1199_s20 = smov 0   ;;  %s1201_s21 = smov 0  }
   0xb   :  { %s1203_s22 = smov 0   ;;  %s1205_s23 = smov 0  }
   0xc   :  { %s1207_s24 = smov 0   ;;  %s1209_s25 = smov 0  }
   0xd LB: > { %1502 = sst [smem:[#allocation7_spill]] %s1130_s19  ;;  %s29_s28 = sadd.s32 1, %s1142_s22  ;;  %s1154_s25 = sphi %s1209_s25, %s17_s25   ;;  %s1150_s24 = sphi %s1207_s24, %s1525_s24   ;;  %s1146_s23 = sphi %s1205_s23, %s1538_s23   ;;  %s1142_s22 = sphi %s1203_s22, %s1537_s22   ;;  %s1138_s21 = sphi %s1201_s21, %s1536_s21   ;;  %s1134_s20 = sphi %s1199_s20, %s1535_s20   ;;  %s1130_s19 = sphi %s1197_s19, %s1534_s19   ;;  %s1126_s18 = sphi %s1195_s18, %s1533_s18   ;;  %s1122_s17 = sphi %s1193_s17, %s1532_s17   ;;  %s1118_s16 = sphi %s1191_s16, %s1531_s16   ;;  %s1114_s15 = sphi %s1189_s15, %s1530_s15   ;;  %s1110_s14 = sphi %s1187_s14, %s1529_s14   ;;  %s1106_s13 = sphi %s1185_s13, %s1528_s13   ;;  %s1102_s12 = sphi %s1183_s12, %s1527_s12  }
   0xe   : > { %1503 = sst [smem:[#allocation8_spill]] %s1134_s20  ;;  %s32_s29 = sadd.s32 1, %s1146_s23 }
   0xf   : > { %1504 = sst [smem:[#allocation9_spill]] %s1150_s24  ;;  %p30_p0 = scmp.ge.s32.totalorder %s29_s28, 2 }
  0x10   : > { %s36_s30 = sadd.s32 1, %s1150_s24  ;;  %s45_s4 = sadd.s32 1, %s1126_s18 }
  0x11   : > { %p52_p1 = scmp.ne.s32.totalorder %s1126_s18, %s1122_s17  ;;  %s1540_s28 = smov (%p30_p0, %s29_s28), 0 }
  0x12   : > { %1505 = sst [smem:[#allocation10_spill]] %s1540_s28  ;;  %s1542_s29 = smov (!%p30_p0, %s32_s29), %s1146_s23 }
  0x13   : > { %s41_s5 = ssub.s32 %s1142_s22, %s1540_s28  ;;  %p53_p2 = scmp.eq.s32.totalorder %s1154_s25, 0 }
  0x14   : > { %p34_p3 = scmp.ge.s32.totalorder %s1542_s29, 2  ;;  %s73_s6 = sadd.s32 1, %s1118_s16 }
  0x15   : > { %p1268_p4 = por %p53_p2, %p52_p1  ;;  %p80_p5 = scmp.ne.s32.totalorder %s1118_s16, %s1114_s15 }
  0x16   : > { %s1544_s29 = smov (%p34_p3, %s1542_s29), 0  ;;  %s1546_s30 = smov (!%p34_p3, %s36_s30), %s1150_s24 }
  0x17   : > { %1507 = sst [smem:[#allocation11_spill]] %s1544_s29  ;;  %s68_s8 = ssub.s32 %s1146_s23, %s1544_s29 }
  0x18   : > { %p1279_p6 = por %p80_p5, %p53_p2  ;;  %p38_p7 = scmp.ge.s32.totalorder %s1546_s30, 2 }
  0x19   : > { %s70_s10 = sor.u32 %s68_s8, %s41_s5  ;;  %s101_s11 = sadd.s32 1, %s1110_s14 }
  0x1a   : > { %p71_p8 = scmp.eq.s32.totalorder %s70_s10, 0  ;;  %s1548_s30 = smov (%p38_p7, %s1546_s30), 0 }
  0x1b   : > { %1509 = sst [smem:[#allocation12_spill]] %s1548_s30  ;;  %s40_s26 = ssub.s32 %s1150_s24, %s1548_s30 }
  0x1c   : > { %s1287_s27 = scalar_select %p71_p8, %s1118_s16, %s73_s6  }
  0x1d   : > { %p111_p9 = scmp.ne.s32.totalorder %s1110_s14, %s1106_s13  ;;  %s42_s28 = sor.u32 %s41_s5, %s40_s26 }
  0x1e   : > { %s98_s29 = sor.u32 %s68_s8, %s40_s26  ;;  %p43_p10 = scmp.eq.s32.totalorder %s42_s28, 0 }
  0x1f   : > { %p99_p11 = scmp.eq.s32.totalorder %s98_s29, 0  ;;  %s1510_s2 = sadd.s32 4294967295, %s1154_s25  }
  0x20   : > { %p112_p12 = scmp.eq.s32.totalorder %s1510_s2, 7  ;;  %p117_p13 = scmp.ne.s32.totalorder %s1106_s13, %s1102_s12 }
  0x21   : > { %s1298_s19 = scalar_select %p43_p10, %s1126_s18, %s45_s4  }
  0x22   : > { %s1301_s3 = scalar_select %p99_p11, %s1110_s14, %s101_s11  }
  0x23   : > { %p1303_p0 = por %p112_p12, %p111_p9  ;;  %s1512_s20 = sadd.s32 4294967294, %s1154_s25  }
  0x24   : > { %p118_p1 = scmp.eq.s32.totalorder %s1512_s20, 7  ;;  %p773_p3 = scmp.ge.s32.totalorder %s1154_s25, 8 }
  0x26   : > { %p1309_p2 = por %p118_p1, %p117_p13  ;;  %162 = sbr.rel (%p773_p3) target bundleno = 76 (0x4c), region = 16 }
  0x2d   : > { %165 = sbr.rel (!%p1268_p4) target bundleno = 56 (0x38), region = 20  ;;  %s167_s2 = sand.u32 (%p1268_p4), 1, %s1126_s18  }
  0x2e   : > { %s805_s26 = sshll.u32 (%p1268_p4), %s1150_s24, 2  ;;  %s774_s28 = sshll.u32 (%p1268_p4), %s167_s2, 3 }
  0x2f   : > { %s172_s29 = sadd.s32 (%p1268_p4), %s1142_s22, %s805_s26  ;;  %s1514_s0 = sld [smem:[#allocation13_spill]] (%p1268_p4) }
  0x30   : > { %s777_s4 = sshll.u32 (%p1268_p4), %s172_s29, 2  ;;  %s169_s11 = scalar_lea.vmem (%p1268_p4), [#allocation2], %s774_s28 }
  0x35   : > { %s174_s8 = scalar_lea.vmem %s1514_s0, %s777_s4 }
  0x36   : > { %v190_v0 = vld [vmem:[%s174_s8] sm:$0xf]  ;;  %v192_v1 = vld [vmem:[%s174_s8 + $0x8] sm:$0xf] }
  0x37   : > { %191 = vst [vmem:[%s169_s11] sm:$0xf] %v190_v0  ;;  %193 = vst [vmem:[%s169_s11 + $0x4] sm:$0xf] %v192_v1 }
  0x38 PF: > { %220 = sbr.rel (!%p1279_p6) target bundleno = 76 (0x4c), region = 61  ;;  %s222_s7 = sand.u32 (%p1279_p6), 1, %s1118_s16  }
  0x39   : > { %s806_s2 = sshll.u32 (%p1279_p6), %s1146_s23, 5  ;;  %s778_s26 = sshll.u32 (%p1279_p6), %s222_s7, 6 }
  0x3a   : > { %s227_s29 = sadd.s32 (%p1279_p6), %s1142_s22, %s806_s2  ;;  %s1515_s1 = sld [smem:[#allocation14_spill]] (%p1279_p6) }
  0x3b   : > { %s781_s30 = sshll.u32 (%p1279_p6), %s227_s29, 2  ;;  %s224_s9 = scalar_lea.vmem (%p1279_p6), [#allocation3], %s778_s26 }
  0x40   : > { %s1330_s4 = scalar_lea.vmem %s1515_s1, %s781_s30 }
  0x41   : > { %v245_v2 = vld [vmem:[%s1330_s4] sm:$0xf]  ;;  %v247_v3 = vld [vmem:[%s1330_s4 + $0x8] sm:$0xf]  ;;  %v249_v4 = vld [vmem:[%s1330_s4 + $0x10] sm:$0xf] }
  0x42   : > { %246 = vst [vmem:[%s224_s9] sm:$0xf] %v245_v2  ;;  %248 = vst [vmem:[%s224_s9 + $0x4] sm:$0xf] %v247_v3  ;;  %v251_v5 = vld [vmem:[%s1330_s4 + $0x18] sm:$0xf] }
  0x43   : > { %250 = vst [vmem:[%s224_s9 + $0x8] sm:$0xf] %v249_v4  ;;  %v253_v6 = vld [vmem:[%s1330_s4 + $0x20] sm:$0xf]  ;;  %v255_v7 = vld [vmem:[%s1330_s4 + $0x28] sm:$0xf] }
  0x44   : > { %252 = vst [vmem:[%s224_s9 + $0xc] sm:$0xf] %v251_v5  ;;  %254 = vst [vmem:[%s224_s9 + $0x10] sm:$0xf] %v253_v6  ;;  %v257_v8 = vld [vmem:[%s1330_s4 + $0x30] sm:$0xf] }
  0x45   : > { %256 = vst [vmem:[%s224_s9 + $0x14] sm:$0xf] %v255_v7  ;;  %v259_v9 = vld [vmem:[%s1330_s4 + $0x38] sm:$0xf]  ;;  %v261_v10 = vld [vmem:[%s1330_s4 + $0x40] sm:$0xf] }
  0x46   : > { %258 = vst [vmem:[%s224_s9 + $0x18] sm:$0xf] %v257_v8  ;;  %260 = vst [vmem:[%s224_s9 + $0x1c] sm:$0xf] %v259_v9  ;;  %v263_v11 = vld [vmem:[%s1330_s4 + $0x48] sm:$0xf] }
  0x47   : > { %262 = vst [vmem:[%s224_s9 + $0x20] sm:$0xf] %v261_v10  ;;  %v265_v12 = vld [vmem:[%s1330_s4 + $0x50] sm:$0xf]  ;;  %v267_v13 = vld [vmem:[%s1330_s4 + $0x58] sm:$0xf] }
  0x48   : > { %264 = vst [vmem:[%s224_s9 + $0x24] sm:$0xf] %v263_v11  ;;  %266 = vst [vmem:[%s224_s9 + $0x28] sm:$0xf] %v265_v12  ;;  %v269_v14 = vld [vmem:[%s1330_s4 + $0x60] sm:$0xf] }
  0x49   : > { %268 = vst [vmem:[%s224_s9 + $0x2c] sm:$0xf] %v267_v13  ;;  %v271_v15 = vld [vmem:[%s1330_s4 + $0x68] sm:$0xf]  ;;  %v273_v16 = vld [vmem:[%s1330_s4 + $0x70] sm:$0xf] }
  0x4a   : > { %270 = vst [vmem:[%s224_s9 + $0x30] sm:$0xf] %v269_v14  ;;  %272 = vst [vmem:[%s224_s9 + $0x34] sm:$0xf] %v271_v15  ;;  %v275_v17 = vld [vmem:[%s1330_s4 + $0x78] sm:$0xf] }
  0x4b   : > { %274 = vst [vmem:[%s224_s9 + $0x38] sm:$0xf] %v273_v16  ;;  %276 = vst [vmem:[%s224_s9 + $0x3c] sm:$0xf] %v275_v17 }
  0x4c PF: > { %p782_p4 = scmp.ge.s32.totalorder %s1154_s25, 1  ;;  %p330_p5 = scmp.lt.s32.totalorder %s1154_s25, 9 }
  0x4e   : > { %p331_p6 = pnand %p782_p4, %p330_p5 }
  0x4f   : > { %s1516_s24 = sld [smem:[#allocation8_spill]] (!%p331_p6)  ;;  %s337_s30 = sand.u32 (!%p331_p6), 1, %s1122_s17  }
  0x50   : > { %334 = sbr.rel (%p331_p6) target bundleno = 475 (0x1db), region = 102  ;;  %s344_s28 = sand.u32 (!%p331_p6), 1, %s1114_s15  }
  0x51   : > { %s1352_s20 = sshll.u32 (!%p331_p6), %s337_s30, 3  ;;  %s784_s8 = sshll.u32 (!%p331_p6), %s344_s28, 6 }
  0x52   : > { %s366_s11 = sand.u32 (!%p331_p6), 1, %s1106_s13   ;;  %p382_p7 = scmp.lt.s32.totalorder (!%p331_p6), %s1138_s21, 1 }
  0x53   : > { %s785_s7 = sshll.u32 (!%p331_p6), %s366_s11, 4  ;;  %s1517_s0 = sld [smem:[#allocation16_spill]] (!%p331_p6) }
  0x54   : > { %s339_s15 = scalar_lea.vmem (!%p331_p6), [#allocation2], %s1352_s20  ;;  %s1367_s17 = scalar_lea.vmem (!%p331_p6), [#allocation3], %s784_s8 }
  0x55   : > { %p384_p8 = scmp.lt.s32.totalorder (!%p331_p6), %s1516_s24, 1  ;;  %s1369_s30 = scalar_lea.vmem (!%p331_p6), [#allocation4], %s785_s7 }
  0x56   : > { %s1518_s28 = sld [smem:[#allocation7_spill]] (!%p331_p6) }
  0x57   : > { %s383_s2 = scalar_select %p382_p7, %s1138_s21, 1 }
  0x58   : > { %s1550_s24 = smov (!%p384_p8, %s1516_s24), 1 }
  0x59   : > { %s786_s26 = sshll.u32 %s383_s2, 1 }
  0x5a   : > { %s387_s29 = sadd.s32 %s786_s26, %s1550_s24 }
  0x5b   : > { %s787_s5 = sshll.u32 %s387_s29, 3 }
  0x5c   : > { %s1364_s1 = scalar_lea.vmem %s1517_s0, %s787_s5  ;;  %p788_p9 = scmp.ne.s32.totalorder %s1518_s28, 0 }
  0x5d   : > { %v1156_v18 = vmov (!%p788_p9), 0.0  }
  0x5e   : > { %394 = sbr.rel (%p788_p9) target bundleno = 101 (0x65), region = 114  ;;  %395 = vst [vmem:[%s1364_s1] sm:$0xff] (!%p788_p9), %v1156_v18  ;;  %396 = vst [vmem:[%s1369_s30] sm:$0xff] (!%p788_p9), %v1156_v18 }
  0x5f   : > { %397 = vst [vmem:[%s1369_s30 + $0x8] sm:$0xff] (!%p788_p9), %v1156_v18 }
  0x65 PF: > { %v1003_v19 = vld [vmem:[%s1367_s17] sm:$0xff]   ;;  %v1157_v20 = vmov 0.0   ;;  %vm1158_vm0 = vmmov 0   ;;  %v1004_v21 = vld [vmem:[%s1367_s17 + $0x8] sm:$0xff]   ;;  %v1005_v22 = vld [vmem:[%s1367_s17 + $0x10] sm:$0xff]   ;;  %p798_p10 = scmp.ne.s32.totalorder %s1138_s21, 0 }
  0x66   : > { %856 = vmatprep.subr.bf16.mxu0 %v1157_v20  ;;  %872 = vmatprep.mubr.msk.bf16.mxu0 %vm1158_vm0, %v1157_v20  ;;  %v1006_v23 = vld [vmem:[%s1367_s17 + $0x18] sm:$0xff]   ;;  %v1007_v24 = vld [vmem:[%s1367_s17 + $0x20] sm:$0xff]   ;;  %v1008_v25 = vld [vmem:[%s1367_s17 + $0x28] sm:$0xff]  }
  0x67   : > { %857 = vmatpush3.bf16.xpose.msra.mxu0 %v1003_v19  ;;  %v1009_v26 = vld [vmem:[%s1367_s17 + $0x30] sm:$0xff]   ;;  %v1010_v27 = vld [vmem:[%s1367_s17 + $0x38] sm:$0xff]   ;;  %v809_v37 = vld [vmem:[%s1367_s17] sm:$0xff] (!%p798_p10)  }
  0x68   : > { %858 = vmatprep.subr.bf16.mxu0 %v1157_v20  ;;  %v1011_v28 = vld [vmem:[%s339_s15] sm:$0xff]   ;;  %v398_v29 = vld [vmem:[%s1369_s30] sm:$0xff]  ;;  %v840_v38 = vld [vmem:[%s1367_s17 + $0x8] sm:$0xff] (!%p798_p10)   ;;  %v810_v39 = vunpack.c.l.bf16 (!%p798_p10), %v809_v37  ;;  %v811_v40 = vunpack.c.h.bf16 (!%p798_p10), %v809_v37 }
  0x69   : > { %v399_v31 = vld [vmem:[%s1369_s30 + $0x8] sm:$0xff]  ;;  %v814_v41 = vunpack.c.l.bf16 (!%p798_p10), %v840_v38  ;;  %v841_v42 = vld [vmem:[%s1367_s17 + $0x10] sm:$0xff] (!%p798_p10)   ;;  %v815_v43 = vunpack.c.h.bf16 (!%p798_p10), %v840_v38  ;;  %v843_v55 = vld [vmem:[%s1367_s17 + $0x20] sm:$0xff] (!%p798_p10)  }
  0x6a   : > { %v554_v44 = vmul.f32 (!%p798_p10), %v810_v39, %v810_v39  ;;  %v555_v45 = vmul.f32 (!%p798_p10), %v811_v40, %v811_v40  ;;  %v818_v46 = vunpack.c.l.bf16 (!%p798_p10), %v841_v42  ;;  %v842_v48 = vld [vmem:[%s1367_s17 + $0x18] sm:$0xff] (!%p798_p10)   ;;  %v819_v49 = vunpack.c.h.bf16 (!%p798_p10), %v841_v42  ;;  %v844_v62 = vld [vmem:[%s1367_s17 + $0x28] sm:$0xff] (!%p798_p10)   ;;  %v845_v5 = vld [vmem:[%s1367_s17 + $0x30] sm:$0xff] (!%p798_p10)  }
  0x6b   : > { %v556_v47 = vmul.f32 (!%p798_p10), %v814_v41, %v814_v41  ;;  %v557_v50 = vmul.f32 (!%p798_p10), %v815_v43, %v815_v43  ;;  %v822_v52 = vunpack.c.l.bf16 (!%p798_p10), %v842_v48  ;;  %v823_v56 = vunpack.c.h.bf16 (!%p798_p10), %v842_v48  ;;  %v846_v12 = vld [vmem:[%s1367_s17 + $0x38] sm:$0xff] (!%p798_p10)  }
  0x6c   : > { %v570_v51 = vadd.f32 (!%p798_p10), %v555_v45, %v554_v44  ;;  %v558_v53 = vmul.f32 (!%p798_p10), %v818_v46, %v818_v46  ;;  %v559_v57 = vmul.f32 (!%p798_p10), %v819_v49, %v819_v49  ;;  %v826_v59 = vunpack.c.l.bf16 (!%p798_p10), %v843_v55 }
  0x6d   : > { %v560_v60 = vmul.f32 (!%p798_p10), %v822_v52, %v822_v52  ;;  %v827_v63 = vunpack.c.h.bf16 (!%p798_p10), %v843_v55  ;;  %v561_v0 = vmul.f32 (!%p798_p10), %v823_v56, %v823_v56  ;;  %v830_v2 = vunpack.c.l.bf16 (!%p798_p10), %v844_v62 }
  0x6e   : > { %v571_v54 = vadd.f32 (!%p798_p10), %v570_v51, %v556_v47  ;;  %v562_v3 = vmul.f32 (!%p798_p10), %v826_v59, %v826_v59  ;;  %v831_v6 = vunpack.c.h.bf16 (!%p798_p10), %v844_v62  ;;  %v834_v9 = vunpack.c.l.bf16 (!%p798_p10), %v845_v5 }
  0x6f   : > { %859 = vmatpush3.bf16.xpose.msra.mxu0 %v1004_v21  ;;  %v563_v7 = vmul.f32 (!%p798_p10), %v827_v63, %v827_v63  ;;  %v564_v10 = vmul.f32 (!%p798_p10), %v830_v2, %v830_v2  ;;  %v835_v13 = vunpack.c.h.bf16 (!%p798_p10), %v845_v5  ;;  %v838_v16 = vunpack.c.l.bf16 (!%p798_p10), %v846_v12 }
  0x70   : > { %860 = vmatprep.subr.bf16.mxu0 %v1157_v20  ;;  %v572_v58 = vadd.f32 (!%p798_p10), %v571_v54, %v557_v50  ;;  %v565_v14 = vmul.f32 (!%p798_p10), %v831_v6, %v831_v6  ;;  %v566_v17 = vmul.f32 (!%p798_p10), %v834_v9, %v834_v9  ;;  %v839_v19 = vunpack.c.h.bf16 (!%p798_p10), %v846_v12 }
  0x72   : > { %v573_v61 = vadd.f32 (!%p798_p10), %v572_v58, %v558_v53 }
  0x74   : > { %v574_v1 = vadd.f32 (!%p798_p10), %v573_v61, %v559_v57 }
  0x76   : > { %v575_v4 = vadd.f32 (!%p798_p10), %v574_v1, %v560_v60 }
  0x77   : > { %861 = vmatpush3.bf16.xpose.msra.mxu0 %v1005_v22  ;;  %v568_v22 = vmul.f32 (!%p798_p10), %v838_v16, %v838_v16 }
  0x78   : > { %862 = vmatprep.subr.bf16.mxu0 %v1157_v20  ;;  %v576_v8 = vadd.f32 (!%p798_p10), %v575_v4, %v561_v0 }
  0x7a   : > { %v577_v11 = vadd.f32 (!%p798_p10), %v576_v8, %v562_v3 }
  0x7c   : > { %v578_v15 = vadd.f32 (!%p798_p10), %v577_v11, %v563_v7 }
  0x7e   : > { %v579_v18 = vadd.f32 (!%p798_p10), %v578_v15, %v564_v10 }
  0x7f   : > { %863 = vmatpush3.bf16.xpose.msra.mxu0 %v1006_v23 }
  0x80   : > { %864 = vmatprep.subr.bf16.mxu0 %v1157_v20  ;;  %v580_v21 = vadd.f32 (!%p798_p10), %v579_v18, %v565_v14 }
  0x82   : > { %v581_v23 = vadd.f32 (!%p798_p10), %v580_v21, %v566_v17 }
  0x87   : > { %865 = vmatpush3.bf16.xpose.msra.mxu0 %v1007_v24  ;;  %v569_v24 = vmul.f32 (!%p798_p10), %v839_v19, %v839_v19 }
  0x88   : > { %866 = vmatprep.subr.bf16.mxu0 %v1157_v20 }
  0x8f   : > { %867 = vmatpush3.bf16.xpose.msra.mxu0 %v1008_v25 }
  0x90   : > { %868 = vmatprep.subr.bf16.mxu0 %v1157_v20 }
  0x97   : > { %869 = vmatpush3.bf16.xpose.msra.mxu0 %v1009_v26 }
  0x98   : > { %870 = vmatprep.subr.bf16.mxu0 %v1157_v20  ;;  %v567_v20 = vmul.f32 (!%p798_p10), %v835_v13, %v835_v13 }
  0x9a   : > { %v582_v25 = vadd.f32 (!%p798_p10), %v581_v23, %v567_v20 }
  0x9c   : > { %v583_v26 = vadd.f32 (!%p798_p10), %v582_v25, %v568_v22 }
  0x9f   : > { %871 = vmatpush3.bf16.xpose.msra.mxu0 %v1010_v27  ;;  %v584_v27 = vadd.f32 (!%p798_p10), %v583_v26, %v569_v24 }
  0xa1   : > { %585 = vadd.xlane.f32.xlu0 (!%p798_p10), %v584_v27 }
  0xa6   : > { %873 = vmatmul.mubr.bf16.vlgmr.msra.gmra.mrb[0].mxu0 %v1011_v28 }
 0x12e   : > { %v586_v28 = vpop.xlane.xlu0 (!%p798_p10), %585 }
 0x178   : > { %520 = sbr.rel (%p798_p10) target bundleno = 446 (0x1be), region = 118 }
 0x179   : > { %v506_v30 = vpop.f32.mrb[0].mxu0 }
 0x17a   : > { %v513_v32 = vadd.f32 %v506_v30, %v398_v29  ;;  %v874_v33 = vpop.f32.mrb[1].mxu0  ;;  %v587_v29 = vrot.slane (!%p798_p10), %v586_v28, 4 }
 0x17b   : > { %v509_v34 = vpop.f32.mrb[2].mxu0 }
 0x17c   : > { %515 = vst [vmem:[%s1369_s30] sm:$0xff] %v513_v32  ;;  %v514_v35 = vadd.f32 %v509_v34, %v399_v31  ;;  %v875_v36 = vpop.f32.mrb[3].mxu0  ;;  %v588_v30 = vadd.f32 (!%p798_p10), %v587_v29, %v586_v28 }
 0x17e   : > { %516 = vst [vmem:[%s1369_s30 + $0x8] sm:$0xff] %v514_v35  ;;  %v589_v31 = vrot.slane (!%p798_p10), %v588_v30, 2  ;;  %v553_v35 = vld [vmem:[%s1364_s1] sm:$0xff] (!%p798_p10) }
 0x180   : > { %v590_v32 = vadd.f32 %v589_v31, %v588_v30 }
 0x182   : > { %v591_v33 = vrot.slane %v590_v32, 1 }
 0x184   : > { %v592_v34 = vadd.f32 %v591_v33, %v590_v32 }
 0x186   : > { %876 = vpush %v592_v34 }
 0x1b7   : > { %s877_s0 = spop %876 }
 0x1b8   : > { %s594_s24 = smul.f32 -0.5, %s877_s0 }
 0x1ba   : > { %v595_v36 = vstv %s594_s24 }
 0x1bb   : > { %v596_v37 = vadd.f32 %v595_v36, %v553_v35 }
 0x1bd   : > { %597 = vst [vmem:[%s1364_s1] sm:$0xff] %v596_v37 }
 0x1be PF: > { %s1519_s20 = sld [smem:[#allocation8_spill]]  ;;  %s807_s8 = sshll.u32 %s1138_s21, 2 }
 0x1bf   : > { %s622_s2 = sshll.u32 %s1369_s30, 4  ;;  %s1520_s4 = sld [smem:[#allocation15_spill]]  ;;  %s1403_s2 = int_to_ptr.vmem [resolvable:$true] %s622_s2 }
 0x1c0   : > { %s1412_s1 = scalar_lea.sflag [#allocation5], %s366_s11  ;;  %s1012_s15 = scalar_lea.vmem %s1403_s2, 256 }
 0x1c1   : > { %p1013_p11 = scmp.ne.s32.totalorder %s1403_s2, %s1012_s15  ;;  %s1159_s21 = smov [#allocation4]  }
 0x1c2   : > { %s1016_s17 = sshll.u32 %s1159_s21, 4  ;;  %s1017_s17 = int_to_ptr.vmem [resolvable:$false] %s1016_s17 }
 0x1c3   : > { %p1014_p12 = pnand %p1013_p11, %p1303_p0  ;;  %s1018_s30 = scalar_lea.vmem %s1017_s17, 512 }
 0x1c4   : > { %s619_s7 = sadd.s32 %s1519_s20, %s807_s8  ;;  %p1019_p1 = scmp.lt.s32.totalorder %s1403_s2, %s1017_s17 }
 0x1c5   : > { %s802_s26 = sshll.u32 %s619_s7, 7  ;;  %p1015_p13 = pneg %p1014_p12 }
 0x1c6   : > { %s1408_s9 = scalar_lea.hbm %s1520_s4, %s802_s26  ;;  %p1020_p3 = scmp.lt.s32.totalorder %s1018_s30, %s1012_s15 }
 0x1c8   : > { %p1021_p4 = por %p1020_p3, %p1019_p1 }
 0x1ca   : > { %p1022_p5 = pnand %p1021_p4, %p1015_p13 }
 0x1cc   : > { %1025 = shalt.err (!%p1022_p5)
}
 0x1cd   : > { %s1026_s11 = scalar_lea.hbm %s1408_s9, 256  ;;  %s1030_s24 = scalar_lea.hbm %s1520_s4, 1024 }
 0x1ce   : > { %p1027_p6 = scmp.ne.s32.totalorder %s1408_s9, %s1026_s11  ;;  %p1031_p9 = scmp.lt.u32.totalorder %s1408_s9, %s1520_s4 }
 0x1cf   : > { %p1032_p10 = scmp.lt.u32.totalorder %s1030_s24, %s1026_s11  ;;  %p1034_p12 = scmp.lt.u32.totalorder %s1026_s11, %s1408_s9 }
 0x1d0   : > { %p1028_p7 = pnand %p1027_p6, %p1303_p0 }
 0x1d1   : > { %p1033_p11 = por %p1032_p10, %p1031_p9 }
 0x1d2   : > { %p1029_p8 = pneg %p1028_p7 }
 0x1d3   : > { %p1035_p13 = por %p1034_p12, %p1033_p11 }
 0x1d5   : > { %p1036_p1 = pnand %p1035_p13, %p1029_p8 }
 0x1d7   : > { %1039 = shalt.err (!%p1036_p1)
}
 0x1d8   : > { %s1160_s7 = smov 128   ;;  %s1161_s26 = smov 256  }
 0x1d9   : > { %s1162_s29 = smov 8  }
 0x1da   : > { %878 = dma.vmem_to_hbm [thread:$0]  (%p1303_p0), %s1403_s2, 256, %s1408_s9, %s1412_s1, %s1160_s7, %s1161_s26, %s1162_s29  }
 0x1db PF: > { %p884_p3 = scmp.ge.s32.totalorder %s1154_s25, 2  ;;  %s640_s5 = sand.u32 1, %s1102_s12  }
 0x1dc   : > { %s641_s15 = scalar_lea.sflag [#allocation5], %s640_s5 }
 0x1dd   : > { %p881_p4 = pnand %p884_p3, %p1309_p2 }
 0x1df   : > { %1097 = dma.done.wait (!%p881_p4), %s641_s15, 256  }
 0x1e0   : > { %1099 = vsyncadd (!%p881_p4), %s641_s15, 4294967040  ;;  %s17_s25 = sadd.s32 1, %s1154_s25   ;;  %s1522_s10 = sld [smem:[#allocation9_spill]] }
 0x1e1   : > { %p1441_p5 = scmp.ge.s32.totalorder %s17_s25, 10   ;;  %s1523_s6 = sld [smem:[#allocation10_spill]] }
 0x1e2   : > { %s1524_s2 = sld [smem:[#allocation11_spill]]  ;;  %s1525_s24 = sld [smem:[#allocation12_spill]] }
 0x1e3   : > { %s1527_s12 = smov %s1106_s13  ;;  %s1528_s13 = smov %s1110_s14 }
 0x1e4   : > { %s1529_s14 = smov %s1301_s3  ;;  %s1530_s15 = smov %s1118_s16 }
 0x1e5   : > { %s1531_s16 = smov %s1287_s27  ;;  %s1532_s17 = smov %s1126_s18 }
 0x1e6   : > { %s1533_s18 = smov %s1298_s19  ;;  %s1534_s19 = smov %s1142_s22 }
 0x1e7   : > { %s1535_s20 = smov %s1146_s23  ;;  %s1536_s21 = smov %s1522_s10 }
 0x1e8   : > { %s1537_s22 = smov %s1523_s6  ;;  %s1538_s23 = smov %s1524_s2 }
 0x1e9   :  { %16 = sbr.rel (!%p1441_p5) target bundleno = 13 (0xd), region = 178 }
 0x1f0   :  { %657 = vsyncpa [#allocation5], 1 }
 0x1f1   :  { %659 = vsyncpa [#allocation5 + $0x1], 1 }

</bundles_post_ra>
